<compile_context>
chip_gen: v6e
topology: v6e:2x2x1
jax: 0.10.0
libtpu: 0.0.40
codegen_flags: <defaults>
</compile_context>

<pallas_src>
import jax
import jax.numpy as jnp
from jax.experimental import pallas as pl
from jax.experimental.pallas import tpu as pltpu


def _round_up(x: int, m: int) -> int:
    return ((x + m - 1) // m) * m


def _make_mlp_kernel(c_out_real: int, eps: float):
    """Fused Linear + LayerNorm + ReLU for one batch tile.

    x_ref: (tb, C_in_p)       input activations tile (channels possibly zero-padded)
    w_ref: (C_in_p, C_out_p)  linear weight, transposed vs. torch, zero-padded
    p_ref: (8, C_out_p)       row 0 = bias, row 1 = LN gamma, row 2 = LN beta
    o_ref: (tb, C_out_p)      output tile (padded lanes written as 0)
    """

    def kernel(x_ref, w_ref, p_ref, o_ref):
        # Linear: x @ W (+ b), accumulate in f32 on the MXU.
        y = jnp.dot(x_ref[...], w_ref[...], preferred_element_type=jnp.float32)
        bias = p_ref[0:1, :].astype(jnp.float32)
        gamma = p_ref[1:2, :].astype(jnp.float32)
        beta = p_ref[2:3, :].astype(jnp.float32)
        y = y + bias  # padded output lanes: W cols and bias are zero -> y == 0 there

        c_out_p = y.shape[-1]
        inv_c = jnp.float32(1.0 / c_out_real)

        # LayerNorm over the real channel count only (biased variance, eps=1e-5).
        if c_out_p == c_out_real:
            mean = jnp.sum(y, axis=-1, keepdims=True) * inv_c
            centered = y - mean
        else:
            lane = jax.lax.broadcasted_iota(jnp.int32, y.shape, 1)
            mask = lane < c_out_real
            mean = jnp.sum(jnp.where(mask, y, 0.0), axis=-1, keepdims=True) * inv_c
            centered = jnp.where(mask, y - mean, 0.0)
        var = jnp.sum(centered * centered, axis=-1, keepdims=True) * inv_c
        y_hat = centered * jax.lax.rsqrt(var + eps)
        y_ln = y_hat * gamma + beta  # padded lanes: gamma=beta=0 -> stays 0

        # ReLU
        o_ref[...] = jnp.maximum(y_ln, 0.0).astype(o_ref.dtype)

    return kernel


def feature_mlp_block(x, w_t, b, gamma, beta, *, tb=256, eps=1e-5, matmul_dtype=None):
    """Fused Linear -> LayerNorm -> ReLU.

    x:      [B, C_in]   activations
    w_t:    [C_in, C_out] linear weight (transposed vs. torch layout)
    b, gamma, beta: [C_out]
    tb:     batch tile (rounded to a multiple of 8, clamped to the padded batch)
    matmul_dtype: optional dtype (e.g. jnp.bfloat16) for the matmul inputs on v6e/v7x;
                  accumulation stays f32 and LayerNorm math stays f32.
    """
    B, C_in = x.shape
    assert w_t.shape[0] == C_in
    C_out = w_t.shape[1]
    out_dtype = x.dtype

    # --- lane-dense channel padding (multiples of 128) ---
    C_in_p = _round_up(C_in, 128)
    C_out_p = _round_up(C_out, 128)

    # --- batch tiling: large tile, clamped for tiny batches, ragged B allowed ---
    tb = max(8, _round_up(min(tb, _round_up(B, 8)), 8))
    grid = pl.cdiv(B, tb)
    B_p = grid * tb

    x_p = jnp.pad(x, ((0, B_p - B), (0, C_in_p - C_in)))
    w_p = jnp.pad(w_t, ((0, C_in_p - C_in), (0, C_out_p - C_out)))
    if matmul_dtype is not None:
        x_p = x_p.astype(matmul_dtype)
        w_p = w_p.astype(matmul_dtype)

    # Stack per-channel params into one (8, C_out_p) block: rows 0/1/2 used.
    params = jnp.zeros((8, C_out_p), jnp.float32)
    params = params.at[0, :C_out].set(b.astype(jnp.float32))
    params = params.at[1, :C_out].set(gamma.astype(jnp.float32))
    params = params.at[2, :C_out].set(beta.astype(jnp.float32))

    # --- VMEM budget: resident weight + double-buffered x/out tiles + params ---
    itemsize_in = jnp.dtype(x_p.dtype).itemsize
    itemsize_out = jnp.dtype(out_dtype).itemsize
    weight_bytes = C_in_p * C_out_p * itemsize_in
    x_tile_bytes = tb * C_in_p * itemsize_in
    o_tile_bytes = tb * C_out_p * itemsize_out
    params_bytes = 8 * C_out_p * 4
    needed = 2 * weight_bytes + 2 * x_tile_bytes + 2 * o_tile_bytes + 2 * params_bytes
    vmem_limit = int(min(max(needed + (4 << 20), 32 << 20), 100 << 20))
    # TODO(synk): if the weight exceeds ~16-24 MiB (v7x 64 MiB VMEM), add K/N grid axes
    # with an f32 acc scratch instead of keeping the whole weight resident.

    kernel = _make_mlp_kernel(C_out, eps)

    out_p = pl.pallas_call(
        kernel,
        out_shape=jax.ShapeDtypeStruct((B_p, C_out_p), out_dtype),
        grid_spec=pltpu.PrefetchScalarGridSpec(
            num_scalar_prefetch=0,
            grid=(grid,),
            in_specs=[
                pl.BlockSpec((tb, C_in_p), lambda i: (i, 0)),       # x tile
                pl.BlockSpec((C_in_p, C_out_p), lambda i: (0, 0)),  # weight (resident)
                pl.BlockSpec((8, C_out_p), lambda i: (0, 0)),       # bias/gamma/beta
            ],
            out_specs=pl.BlockSpec((tb, C_out_p), lambda i: (i, 0)),
        ),
        compiler_params=pltpu.CompilerParams(
            dimension_semantics=("parallel",),
            vmem_limit_bytes=vmem_limit,
        ),
    )(x_p, w_p, params)

    return out_p[:B, :C_out]


def reference_mlp_block(x, w_t, b, gamma, beta, eps=1e-5):
    """Pure-JAX reference matching torch Linear -> LayerNorm(eps=1e-5) -> ReLU."""
    y = x @ w_t + b
    mean = jnp.mean(y, axis=-1, keepdims=True)
    var = jnp.mean((y - mean) ** 2, axis=-1, keepdims=True)
    y_hat = (y - mean) / jnp.sqrt(var + eps)
    y_ln = y_hat * gamma + beta
    return jnp.maximum(y_ln, 0.0)


def _make_params(key, c_in, c_out):
    kw, kb = jax.random.split(key)
    bound = 1.0 / (c_in ** 0.5)
    w_t = jax.random.uniform(kw, (c_in, c_out), jnp.float32, -bound, bound)
    b = jax.random.uniform(kb, (c_out,), jnp.float32, -bound, bound)
    gamma = jnp.ones((c_out,), jnp.float32)
    beta = jnp.zeros((c_out,), jnp.float32)
    return w_t, b, gamma, beta


if __name__ == "__main__":
    key = jax.random.PRNGKey(0)
    k1, k2, k3 = jax.random.split(key, 3)

    # --- Test 1: small shapes consistent with forward(x: [B, C]), f32 matmul ---
    B, C_in, C_out = 16, 16, 32
    x = jax.random.normal(k1, (B, C_in), jnp.float32)
    w_t, b, gamma, beta = _make_params(k2, C_in, C_out)

    out = feature_mlp_block(x, w_t, b, gamma, beta)
    out = jax.block_until_ready(out)
    ref = reference_mlp_block(x, w_t, b, gamma, beta)
    assert out.shape == (B, C_out)
    assert jnp.allclose(out, ref, atol=1e-5, rtol=1e-5), "f32 mismatch vs reference"

    # --- Test 2: ragged batch + non-128 channels exercise padding/masked-LN path ---
    B2, C_in2, C_out2 = 200, 48, 96
    x2 = jax.random.normal(k3, (B2, C_in2), jnp.float32)
    w_t2, b2, gamma2, beta2 = _make_params(k2, C_in2, C_out2)
    out2 = jax.block_until_ready(
        feature_mlp_block(x2, w_t2, b2, gamma2, beta2, tb=64))
    ref2 = reference_mlp_block(x2, w_t2, b2, gamma2, beta2)
    assert out2.shape == (B2, C_out2)
    assert jnp.allclose(out2, ref2, atol=1e-5, rtol=1e-5), "padded-path mismatch"

    # --- Test 3: bf16 matmul inputs (v6e/v7x fast path), f32 accumulation/LN ---
    out3 = jax.block_until_ready(
        feature_mlp_block(x, w_t, b, gamma, beta, matmul_dtype=jnp.bfloat16))
    assert jnp.allclose(out3, ref, atol=5e-2, rtol=5e-2), "bf16 path mismatch"

    print("KERNEL_OK")
</pallas_src>

<mosaic_0001>
module attributes {stable_mosaic.version = 11 : i64} {
  func.func @kernel(%arg0: i32, %arg1: memref<16x128xf32, #tpu.memory_space<vmem>>, %arg2: memref<128x128xf32, #tpu.memory_space<vmem>>, %arg3: memref<8x128xf32, #tpu.memory_space<vmem>>, %arg4: memref<16x128xf32, #tpu.memory_space<vmem>>) attributes {dimension_semantics = [#tpu.dimension_semantics<parallel>], iteration_bounds = array<i64: 1>, scalar_prefetch = 0 : i64, scratch_operands = 0 : i64, tpu.core_type = #tpu.core_type<tc>, window_params = [{transform_indices = @transform_0, window_bounds = array<i64: 16, 128>}, {pipeline_mode = #tpu.pipeline_mode<synchronous>, transform_indices = @transform_1, window_bounds = array<i64: 128, 128>}, {pipeline_mode = #tpu.pipeline_mode<synchronous>, transform_indices = @transform_2, window_bounds = array<i64: 8, 128>}, {transform_indices = @transform_3, window_bounds = array<i64: 16, 128>}]} {
    %c0 = arith.constant 0 : index
    %c0_0 = arith.constant 0 : index
    %0 = vector.load %arg1[%c0, %c0_0] : memref<16x128xf32, #tpu.memory_space<vmem>>, vector<16x128xf32>
    %c0_1 = arith.constant 0 : index
    %c0_2 = arith.constant 0 : index
    %1 = vector.load %arg2[%c0_1, %c0_2] : memref<128x128xf32, #tpu.memory_space<vmem>>, vector<128x128xf32>
    %cst = arith.constant dense<0.000000e+00> : vector<16x128xf32>
    %2 = tpu.matmul %0, %1, %cst {dimension_numbers = #tpu.dot_dimension_numbers<[1], [0], [0], [1], [0, 0, 1, 1], [], []>} : vector<16x128xf32>, vector<128x128xf32>, vector<16x128xf32> -> vector<16x128xf32>
    %c0_3 = arith.constant 0 : index
    %c0_4 = arith.constant 0 : index
    %3 = vector.load %arg3[%c0_3, %c0_4] : memref<8x128xf32, #tpu.memory_space<vmem>>, vector<1x128xf32>
    %c1 = arith.constant 1 : index
    %c0_5 = arith.constant 0 : index
    %4 = vector.load %arg3[%c1, %c0_5] : memref<8x128xf32, #tpu.memory_space<vmem>>, vector<1x128xf32>
    %c2 = arith.constant 2 : index
    %c0_6 = arith.constant 0 : index
    %5 = vector.load %arg3[%c2, %c0_6] : memref<8x128xf32, #tpu.memory_space<vmem>>, vector<1x128xf32>
    %6 = vector.broadcast %3 : vector<1x128xf32> to vector<16x128xf32>
    %7 = arith.addf %2, %6 : vector<16x128xf32>
    %8 = tpu.iota {dimensions = array<i32: 1>} : vector<16x128xi32>
    %c32_i32 = arith.constant 32 : i32
    %9 = vector.broadcast %c32_i32 : i32 to vector<16x128xi32>
    %10 = arith.cmpi slt, %8, %9 : vector<16x128xi32>
    %cst_7 = arith.constant 0.000000e+00 : f32
    %11 = vector.broadcast %cst_7 : f32 to vector<16x128xf32>
    %12 = arith.select %10, %7, %11 : vector<16x128xi1>, vector<16x128xf32>
    %cst_8 = arith.constant dense<0.000000e+00> : vector<16xf32>
    %13 = vector.multi_reduction <add>, %12, %cst_8 [1] : vector<16x128xf32> to vector<16xf32>
    %14 = vector.shape_cast %13 : vector<16xf32> to vector<16x1xf32>
    %cst_9 = arith.constant 3.125000e-02 : f32
    %15 = vector.broadcast %cst_9 : f32 to vector<16x1xf32>
    %16 = arith.mulf %14, %15 : vector<16x1xf32>
    %17 = vector.broadcast %16 : vector<16x1xf32> to vector<16x128xf32>
    %18 = arith.subf %7, %17 : vector<16x128xf32>
    %cst_10 = arith.constant 0.000000e+00 : f32
    %19 = vector.broadcast %cst_10 : f32 to vector<16x128xf32>
    %20 = arith.select %10, %18, %19 : vector<16x128xi1>, vector<16x128xf32>
    %21 = arith.mulf %20, %20 : vector<16x128xf32>
    %cst_11 = arith.constant dense<0.000000e+00> : vector<16xf32>
    %22 = vector.multi_reduction <add>, %21, %cst_11 [1] : vector<16x128xf32> to vector<16xf32>
    %23 = vector.shape_cast %22 : vector<16xf32> to vector<16x1xf32>
    %cst_12 = arith.constant 3.125000e-02 : f32
    %24 = vector.broadcast %cst_12 : f32 to vector<16x1xf32>
    %25 = arith.mulf %23, %24 : vector<16x1xf32>
    %cst_13 = arith.constant 9.99999974E-6 : f32
    %26 = vector.broadcast %cst_13 : f32 to vector<16x1xf32>
    %27 = arith.addf %25, %26 : vector<16x1xf32>
    %28 = math.rsqrt %27 : vector<16x1xf32>
    %29 = vector.broadcast %28 : vector<16x1xf32> to vector<16x128xf32>
    %30 = arith.mulf %20, %29 : vector<16x128xf32>
    %31 = vector.broadcast %4 : vector<1x128xf32> to vector<16x128xf32>
    %32 = arith.mulf %30, %31 : vector<16x128xf32>
    %33 = vector.broadcast %5 : vector<1x128xf32> to vector<16x128xf32>
    %34 = arith.addf %32, %33 : vector<16x128xf32>
    %cst_14 = arith.constant 0.000000e+00 : f32
    %35 = vector.broadcast %cst_14 : f32 to vector<16x128xf32>
    %36 = arith.maximumf %34, %35 : vector<16x128xf32>
    %c0_15 = arith.constant 0 : index
    %c0_16 = arith.constant 0 : index
    %37 = vector.load %arg4[%c0_15, %c0_16] : memref<16x128xf32, #tpu.memory_space<vmem>>, vector<16x128xf32>
    tpu.vector_store %arg4[%c0_15, %c0_16], %36 {strides = array<i32>} : memref<16x128xf32, #tpu.memory_space<vmem>>, vector<16x128xf32>,
    return
  }
  func.func @transform_0(%arg0: i32) -> (i32, i32) {
    %c0_i32 = arith.constant 0 : i32
    %c0_i32_0 = arith.constant 0 : i32
    return %arg0, %c0_i32 : i32, i32
  }
  func.func @transform_1(%arg0: i32) -> (i32, i32) {
    %c0_i32 = arith.constant 0 : i32
    %c0_i32_0 = arith.constant 0 : i32
    %c0_i32_1 = arith.constant 0 : i32
    return %c0_i32, %c0_i32_0 : i32, i32
  }
  func.func @transform_2(%arg0: i32) -> (i32, i32) {
    %c0_i32 = arith.constant 0 : i32
    %c0_i32_0 = arith.constant 0 : i32
    %c0_i32_1 = arith.constant 0 : i32
    return %c0_i32, %c0_i32_0 : i32, i32
  }
  func.func @transform_3(%arg0: i32) -> (i32, i32) {
    %c0_i32 = arith.constant 0 : i32
    %c0_i32_0 = arith.constant 0 : i32
    return %arg0, %c0_i32 : i32, i32
  }
}

</mosaic_0001>

<bundles_post_ra>
// kernel: tpu_custom_call.1
= control target key start
LH: loop header
LB: loop body
LE: loop exit
PB: predicated region body
PF: predicated region fallthrough
CT: control target
= control target key end

     0   :  { %8 = vsyncpa [#allocation3], 0  ;;  %s416_s0 = inlined_call_operand.hbm [shape: f32[16,128], index: 0, kind: input, shape index: {}]   ;;  %s417_s1 = inlined_call_operand.hbm [shape: f32[128,128], index: 1, kind: input, shape index: {}]   ;;  %s418_s2 = inlined_call_operand.hbm [shape: f32[8,128], index: 2, kind: input, shape index: {}]   ;;  %s419_s3 = inlined_call_operand.hbm [shape: f32[16,128], index: 3, kind: output, shape index: {}]  }
   0x1   :  { %9 = vsyncpa [#allocation6], 0 }
   0x2   :  { %10 = vsyncpa [#allocation4], 0  ;;  %s369_s12 = smov [#allocation5]   ;;  %s370_s14 = smov [#allocation2]  }
   0x3   :  { %s28_s13 = sshll.u32 %s369_s12, 4  ;;  %s16_s15 = sshll.u32 %s370_s14, 4  ;;  %s29_s13 = int_to_ptr.vmem [resolvable:$true] %s28_s13  ;;  %s17_s15 = int_to_ptr.vmem [resolvable:$true] %s16_s15 }
   0x4   :  { %s291_s16 = scalar_lea.vmem %s29_s13, 2048  ;;  %p296_p1 = scmp.lt.s32.totalorder %s29_s13, %s29_s13 }
   0x5   :  { %p292_p0 = scmp.ne.s32.totalorder %s29_s13, %s291_s16  ;;  %p297_p2 = scmp.lt.s32.totalorder %s291_s16, %s291_s16 }
   0x7   :  { %p298_p3 = por %p297_p2, %p296_p1 }
   0x9   :  { %p299_p4 = pnand %p298_p3, %p292_p0 }
   0xb   :  { %302 = shalt.err (!%p299_p4)
}
   0xc   :  { %s371_s17 = smov 128   ;;  %s372_s18 = smov 8  }
   0xd   :  { %34 = dma.hbm_to_vmem [thread:$0]  %s417_s1, 2048, %s29_s13, [#allocation6], %s371_s17, %s371_s17, %s372_s18  }
   0xe   :  { %s311_s21 = scalar_lea.vmem %s17_s15, 256  ;;  %p316_p6 = scmp.lt.s32.totalorder %s17_s15, %s17_s15 }
   0xf   :  { %p312_p5 = scmp.ne.s32.totalorder %s17_s15, %s311_s21  ;;  %p317_p7 = scmp.lt.s32.totalorder %s311_s21, %s311_s21 }
  0x11   :  { %p318_p8 = por %p317_p7, %p316_p6 }
  0x13   :  { %p319_p9 = pnand %p318_p8, %p312_p5 }
  0x15   :  { %322 = shalt.err (!%p319_p9)
}
  0x16   :  { %22 = dma.hbm_to_vmem [thread:$0]  %s416_s0, 256, %s17_s15, [#allocation3], %s371_s17, %s371_s17, %s372_s18  }
  0x17   :  { %s373_s24 = smov [#allocation7]  }
  0x18   :  { %s41_s25 = sshll.u32 %s373_s24, 4  ;;  %s42_s25 = int_to_ptr.vmem [resolvable:$true] %s41_s25 }
  0x19   :  { %s331_s26 = scalar_lea.vmem %s42_s25, 128  ;;  %p336_p11 = scmp.lt.s32.totalorder %s42_s25, %s42_s25 }
  0x1a   :  { %p332_p10 = scmp.ne.s32.totalorder %s42_s25, %s331_s26  ;;  %p337_p12 = scmp.lt.s32.totalorder %s331_s26, %s331_s26 }
  0x1c   :  { %p338_p13 = por %p337_p12, %p336_p11 }
  0x1e   :  { %p339_p0 = pnand %p338_p13, %p332_p10 }
  0x20   :  { %342 = shalt.err (!%p339_p0)
}
  0x21   :  { %44 = dma.hbm_to_vmem [thread:$0]  %s418_s2, 128, %s42_s25, [#allocation6]  }
  0x22   :  { %363 = dma.done.wait [#allocation3], 256  }
  0x23   :  { %364 = vsyncadd [#allocation3], 4294967040 }
  0x24   :  { %365 = dma.done.wait [#allocation6], 2176  }
  0x25   :  { %366 = vsyncadd [#allocation6], 4294965120  ;;  %v71_v0 = vld [vmem:[#allocation5 + $0x78] sm:$0xff]  ;;  %v70_v1 = vld [vmem:[#allocation5 + $0x70] sm:$0xff]  ;;  %v154_v18 = vlaneseq  ;;  %s374_s0 = smov [#allocation8]  }
  0x26   :  { %238 = vmatprep.subr.mxu0 %v71_v0  ;;  %v69_v2 = vld [vmem:[#allocation5 + $0x68] sm:$0xff]  ;;  %v68_v3 = vld [vmem:[#allocation5 + $0x60] sm:$0xff]  ;;  %v54_v4 = vld [vmem:[#allocation2] sm:$0xff]  ;;  %s204_s2 = sshll.u32 %s374_s0, 4  ;;  %s205_s2 = int_to_ptr.vmem [resolvable:$true] %s204_s2 }
  0x27   :  { %239 = vmatpush3.msra.mxu0 %v71_v0  ;;  %v67_v5 = vld [vmem:[#allocation5 + $0x58] sm:$0xff]  ;;  %270 = vmatprep.mubr.f32.mxu0 %v54_v4  ;;  %v66_v6 = vld [vmem:[#allocation5 + $0x50] sm:$0xff]  ;;  %v65_v7 = vld [vmem:[#allocation5 + $0x48] sm:$0xff]  ;;  %v155_v20 = vand.u32 127, %v154_v18  ;;  %s343_s28 = scalar_lea.vmem %s205_s2, 256  ;;  %p348_p2 = scmp.lt.s32.totalorder %s205_s2, %s205_s2 }
  0x28   :  { %240 = vmatprep.subr.mxu0 %v70_v1  ;;  %v64_v8 = vld [vmem:[#allocation5 + $0x40] sm:$0xff]  ;;  %v63_v9 = vld [vmem:[#allocation5 + $0x38] sm:$0xff]  ;;  %v62_v10 = vld [vmem:[#allocation5 + $0x30] sm:$0xff]  ;;  %p344_p1 = scmp.ne.s32.totalorder %s205_s2, %s343_s28  ;;  %p349_p3 = scmp.lt.s32.totalorder %s343_s28, %s343_s28 }
  0x29   :  { %241 = vmatpush3.msra.mxu0 %v70_v1  ;;  %v61_v11 = vld [vmem:[#allocation5 + $0x28] sm:$0xff]  ;;  %v60_v12 = vld [vmem:[#allocation5 + $0x20] sm:$0xff]  ;;  %v59_v13 = vld [vmem:[#allocation5 + $0x18] sm:$0xff]  ;;  %vm156_vm0 = vcmp.lt.s32.totalorder %v155_v20, 32 }
  0x2a   :  { %242 = vmatprep.subr.mxu0 %v69_v2  ;;  %v58_v14 = vld [vmem:[#allocation5 + $0x10] sm:$0xff]  ;;  %v57_v15 = vld [vmem:[#allocation5 + $0x8] sm:$0xff]  ;;  %v56_v16 = vld [vmem:[#allocation5] sm:$0xff]  ;;  %p350_p4 = por %p349_p3, %p348_p2 }
  0x2b   :  { %243 = vmatpush3.msra.mxu0 %v69_v2  ;;  %v55_v17 = vld [vmem:[#allocation2 + $0x8] sm:$0xff]  ;;  %v217_v21 = vld [vmem:[#allocation7] ss:$0 sm:$0xff]  ;;  %v218_v44 = vld [vmem:[#allocation7 + $0x1] ss:$0 sm:$0xff] }
  0x2c   :  { %244 = vmatprep.subr.mxu0 %v68_v3  ;;  %v219_v46 = vld [vmem:[#allocation7 + $0x2] ss:$0 sm:$0xff]  ;;  %p351_p5 = pnand %p350_p4, %p344_p1 }
  0x2d   :  { %245 = vmatpush3.msra.mxu0 %v68_v3 }
  0x2e   :  { %246 = vmatprep.subr.mxu0 %v67_v5 }
  0x2f   :  { %247 = vmatpush3.msra.mxu0 %v67_v5 }
  0x30   :  { %248 = vmatprep.subr.mxu0 %v66_v6 }
  0x31   :  { %249 = vmatpush3.msra.mxu0 %v66_v6 }
  0x32   :  { %250 = vmatprep.subr.mxu0 %v65_v7 }
  0x33   :  { %251 = vmatpush3.msra.mxu0 %v65_v7 }
  0x34   :  { %252 = vmatprep.subr.mxu0 %v64_v8 }
  0x35   :  { %253 = vmatpush3.msra.mxu0 %v64_v8 }
  0x36   :  { %254 = vmatprep.subr.mxu0 %v63_v9 }
  0x37   :  { %255 = vmatpush3.msra.mxu0 %v63_v9 }
  0x38   :  { %256 = vmatprep.subr.mxu0 %v62_v10 }
  0x39   :  { %257 = vmatpush3.msra.mxu0 %v62_v10 }
  0x3a   :  { %258 = vmatprep.subr.mxu0 %v61_v11 }
  0x3b   :  { %259 = vmatpush3.msra.mxu0 %v61_v11 }
  0x3c   :  { %260 = vmatprep.subr.mxu0 %v60_v12 }
  0x3d   :  { %261 = vmatpush3.msra.mxu0 %v60_v12 }
  0x3e   :  { %262 = vmatprep.subr.mxu0 %v59_v13 }
  0x3f   :  { %263 = vmatpush3.msra.mxu0 %v59_v13 }
  0x40   :  { %264 = vmatprep.subr.mxu0 %v58_v14 }
  0x41   :  { %265 = vmatpush3.msra.mxu0 %v58_v14 }
  0x42   :  { %266 = vmatprep.subr.mxu0 %v57_v15 }
  0x43   :  { %267 = vmatpush3.msra.mxu0 %v57_v15 }
  0x44   :  { %268 = vmatprep.subr.mxu0 %v56_v16 }
  0x45   :  { %269 = vmatpush3.msra.mxu0 %v56_v16 }
  0x46   :  { %271 = vmatmul.mubr.f32.vlgmr.msra.gmra.mxu0 %v55_v17 }
 0x106   :  { %v272_v19 = vpop.f32.mrf.mxu0 }
 0x107   :  { %v151_v24 = vadd.f32 %v272_v19, %v217_v21 }
 0x108   :  { %v145_v22 = vpop.f32.mrf.mxu0 }
 0x109   :  { %v146_v23 = vadd.f32 %v217_v21, %v145_v22  ;;  %v158_v26 = vsel %vm156_vm0, %v151_v24, 0.0 }
 0x10b   :  { %v157_v25 = vsel %vm156_vm0, %v146_v23, 0.0 }
 0x10c   :  { %159 = vadd.xlane.f32.xlu0 %v157_v25 }
 0x110   :  { %161 = vadd.xlane.f32.xlu0 %v158_v26 }
 0x195   :  { %v160_v27 = vpop.xlane.xlu0 %159 }
 0x196   :  { %v163_v28 = vmul.f32 0.03125, %v160_v27 }
 0x198   :  { %v165_v29 = vsub.f32 %v146_v23, %v163_v28 }
 0x199   :  { %v162_v30 = vpop.xlane.xlu0 %161 }
 0x19a   :  { %v164_v31 = vmul.f32 0.03125, %v162_v30  ;;  %v167_v32 = vsel %vm156_vm0, %v165_v29, 0.0 }
 0x19b   :  { %v169_v33 = vmul.f32 %v167_v32, %v167_v32 }
 0x19c   :  { %v166_v34 = vsub.f32 %v151_v24, %v164_v31 }
 0x19d   :  { %171 = vadd.xlane.f32.xlu1 %v169_v33 }
 0x19e   :  { %v168_v35 = vsel %vm156_vm0, %v166_v34, 0.0 }
 0x19f   :  { %v170_v36 = vmul.f32 %v168_v35, %v168_v35 }
 0x1a1   :  { %173 = vadd.xlane.f32.xlu1 %v170_v36 }
 0x226   :  { %v172_v37 = vpop.xlane.xlu1 %171 }
 0x227   :  { %v175_v38 = vmul.f32 0.03125, %v172_v37 }
 0x229   :  { %v177_v39 = vadd.f32 1e-05, %v175_v38 }
 0x22a   :  { %v174_v40 = vpop.xlane.xlu1 %173 }
 0x22b   :  { %279 = vrsqrt.f32 %v177_v39  ;;  %v176_v41 = vmul.f32 0.03125, %v174_v40 }
 0x22d   :  { %v178_v42 = vadd.f32 1e-05, %v176_v41 }
 0x22f   :  { %281 = vrsqrt.f32 %v178_v42 }
 0x238   :  { %v280_v43 = vpop.eup %279 }
 0x239   :  { %v181_v45 = vmul.f32 %v280_v43, %v167_v32 }
 0x23b   :  { %v187_v47 = vmul.f32 %v218_v44, %v181_v45 }
 0x23c   :  { %v282_v48 = vpop.eup %281 }
 0x23d   :  { %v182_v49 = vmul.f32 %v282_v48, %v168_v35  ;;  %v193_v50 = vadd.f32 %v219_v46, %v187_v47 }
 0x23f   :  { %v188_v51 = vmul.f32 %v218_v44, %v182_v49  ;;  %v195_v52 = vmax.f32 %v193_v50, 0.0 }
 0x241   :  { %v194_v53 = vadd.f32 %v219_v46, %v188_v51  ;;  %197 = vst [vmem:[#allocation8] sm:$0xff] %v195_v52 }
 0x243   :  { %v196_v54 = vmax.f32 %v194_v53, 0.0 }
 0x245   :  { %198 = vst [vmem:[#allocation8 + $0x8] sm:$0xff] %v196_v54 }
 0x246   :  { %354 = shalt.err (!%p351_p5)
}
 0x247   :  { %210 = dma.vmem_to_hbm [thread:$0]  %s205_s2, 256, %s419_s3, [#allocation4], %s371_s17, %s371_s17, %s372_s18  }
 0x248   :  { %367 = dma.done.wait [#allocation4], 256  }
 0x249   :  { %368 = vsyncadd [#allocation4], 4294967040 }
 0x24a   :  { %214 = vsyncpa [#allocation3], 1 }
 0x24b   :  { %215 = vsyncpa [#allocation6], 1 }
 0x24c   :  { %216 = vsyncpa [#allocation4], 1 }

</bundles_post_ra>
